<compile_context>
chip_gen: v5e
topology: v5e:2x2
jax: 0.10.0
libtpu: 0.0.40
codegen_flags: <defaults>
</compile_context>

<pallas_src>
import functools

import jax
import jax.numpy as jnp
from jax.experimental import pallas as pl
from jax.experimental.pallas import tpu as pltpu

# Hidden sizes of the MLP (from the PyTorch __init__)
HIDDEN = (256, 128, 64, 16, 1)


def mlp_kernel(x_ref,
               w1_ref, b1_ref,
               w2_ref, b2_ref,
               w3_ref, b3_ref,
               w4_ref, b4_ref,
               w5_ref, b5_ref,
               o_ref):
    """Fused 5-layer MLP.

    w1..w4 are (in_features, out_features) bf16; w5 is the last layer's weight
    stored as a (1, 16) row so the final matmul produces the lane-dense
    (1, batch_tile) output row directly.  Biases are f32 rows.
    """

    def dense_relu(h, w_ref, b_ref):
        # bf16 x bf16 -> f32 accumulate on the MXU; bias + ReLU in f32 (VPU);
        # the activation is carried to the next layer in bf16.
        acc = jnp.dot(h, w_ref[...], preferred_element_type=jnp.float32)
        return jnp.maximum(acc + b_ref[...], 0.0).astype(jnp.bfloat16)

    h = x_ref[...].astype(jnp.bfloat16)          # (bt, D)  (no wrapper cast)
    h = dense_relu(h, w1_ref, b1_ref)            # (bt, 256)
    h = dense_relu(h, w2_ref, b2_ref)            # (bt, 128)
    h = dense_relu(h, w3_ref, b3_ref)            # (bt, 64)
    h = dense_relu(h, w4_ref, b4_ref)            # (bt, 16)

    # Final Linear(16, 1): contract over K=16 with the RHS's minor dim
    # (A . B^T) so the result is already the lane-dense (1, batch_tile) row.
    logits = jax.lax.dot_general(
        w5_ref[...], h,
        dimension_numbers=(((1,), (1,)), ((), ())),
        preferred_element_type=jnp.float32) + b5_ref[...]       # (1, bt)
    o_ref[...] = jax.nn.sigmoid(logits).astype(o_ref.dtype)


def init_mlp_params(key, input_size):
    """Matches the PyTorch init: W ~ N(0, 1/(input_size+1)), b = 0.
       Weights stored as (in_features, out_features)."""
    dims = (input_size,) + HIDDEN
    std = 1.0 / (input_size + 1)
    params = []
    keys = jax.random.split(key, len(HIDDEN))
    for k, d_in, d_out in zip(keys, dims[:-1], dims[1:]):
        w = std * jax.random.normal(k, (d_in, d_out), dtype=jnp.float32)
        b = jnp.zeros((1, d_out), dtype=jnp.float32)   # 2D rows for TPU layout
        params.append((w, b))
    return params


def prepare_params(params):
    """One-time conversion to the kernel's layout: bf16 weights (last layer
    transposed to a (1, 16) row) and f32 bias rows.  Done OUTSIDE the jitted
    forward so the casts/transpose never re-execute on the hot path."""
    flat = []
    n_layers = len(params)
    for idx, (w, b) in enumerate(params):
        if idx == n_layers - 1:
            w = w.T                                     # (1, 16)
        flat.append(jnp.asarray(w, dtype=jnp.bfloat16))
        flat.append(jnp.asarray(b, dtype=jnp.float32))
    return tuple(flat)


def _choose_tile(batch, max_batch_tile):
    """Pick the batch tile.

    * batch < 256: one grid step, block == whole batch (any size is legal
      because the block equals the full array dims).
    * batch >= 256: aim for ~4 grid steps (>= 2, so both v7x TensorCores are
      used), tile rounded up to a multiple of 128 (lane-dense output blocks),
      capped at max_batch_tile.  The last grid block may be ragged; Pallas
      masks it, so no wrapper-side padding is needed.
    """
    assert max_batch_tile >= 128 and max_batch_tile % 128 == 0, (
        "max_batch_tile must be a multiple of 128")
    if batch < 256:
        return batch
    target = -(-batch // 4)                       # ~4 grid steps
    tile = ((target + 127) // 128) * 128          # round up to 128-multiple
    return max(128, min(tile, max_batch_tile))


@functools.partial(jax.jit, static_argnames=("max_batch_tile",))
def mlp_forward(x, flat_params, max_batch_tile=2048):
    B, D = x.shape
    tile = _choose_tile(B, max_batch_tile)
    grid = (pl.cdiv(B, tile),)

    in_specs = [pl.BlockSpec((tile, D), lambda i: (i, 0))]
    for a in flat_params:
        # Constant block index: each weight/bias is DMA'd only once across the
        # whole grid and stays resident in VMEM (~100 KB total).
        in_specs.append(pl.BlockSpec(a.shape, lambda i: (0, 0)))

    out_row = pl.pallas_call(
        mlp_kernel,
        out_shape=jax.ShapeDtypeStruct((1, B), jnp.float32),
        grid_spec=pltpu.PrefetchScalarGridSpec(
            num_scalar_prefetch=0,
            grid=grid,
            in_specs=in_specs,
            # Lane-dense (1, tile) output blocks -> unmasked stores; the last
            # (possibly ragged) block is masked by Pallas.
            out_specs=pl.BlockSpec((1, tile), lambda i: (0, i)),
        ),
        compiler_params=pltpu.CompilerParams(
            dimension_semantics=("parallel",),
            vmem_limit_bytes=64 * 1024 * 1024),
    )(x, *flat_params)

    # Back to the PyTorch (B, 1) layout.
    return out_row.reshape(B, 1)


def mlp_reference(x, params, bf16=True):
    """Pure-JAX reference.  With bf16=True it mirrors the kernel's
    bf16-inputs / f32-accumulate matmuls and bf16 activation carry; with
    bf16=False it is the plain f32 semantics of the original PyTorch module."""
    h = x
    n = len(params)
    for i, (w, b) in enumerate(params):
        if bf16:
            h = jnp.dot(h.astype(jnp.bfloat16), w.astype(jnp.bfloat16),
                        preferred_element_type=jnp.float32) + b
        else:
            h = jnp.dot(h.astype(jnp.float32), w,
                        preferred_element_type=jnp.float32) + b
        if i < n - 1:
            h = jnp.maximum(h, 0.0)
            if bf16:
                h = h.astype(jnp.bfloat16)
    return jax.nn.sigmoid(h)


if __name__ == "__main__":
    key = jax.random.PRNGKey(0)
    k_x1, k_x2, k_p = jax.random.split(key, 3)

    input_size = 32
    params = init_mlp_params(k_p, input_size)
    flat_params = prepare_params(params)

    # Case 1: small batch -> single grid step, whole batch as one block.
    x1 = jax.random.normal(k_x1, (16, input_size), dtype=jnp.float32)
    out1 = jax.block_until_ready(mlp_forward(x1, flat_params))
    assert out1.shape == (16, 1), out1.shape
    assert jnp.allclose(out1, mlp_reference(x1, params, bf16=True),
                        atol=1e-3, rtol=1e-3), "mismatch vs bf16 reference (1)"
    assert jnp.allclose(out1, mlp_reference(x1, params, bf16=False),
                        atol=1e-2, rtol=1e-2), "mismatch vs f32 reference (1)"

    # Case 2: non-multiple batch -> multi-step grid with a ragged (masked)
    # last block, no wrapper-side padding, lane-dense tiled output.
    x2 = jax.random.normal(k_x2, (300, input_size), dtype=jnp.float32)
    out2 = jax.block_until_ready(
        mlp_forward(x2, flat_params, max_batch_tile=128))
    assert out2.shape == (300, 1), out2.shape
    assert jnp.allclose(out2, mlp_reference(x2, params, bf16=True),
                        atol=1e-3, rtol=1e-3), "mismatch vs bf16 reference (2)"
    assert jnp.allclose(out2, mlp_reference(x2, params, bf16=False),
                        atol=1e-2, rtol=1e-2), "mismatch vs f32 reference (2)"

    print("KERNEL_OK")
</pallas_src>

<mosaic_0001>
module attributes {stable_mosaic.version = 11 : i64} {
  func.func @mlp_kernel(%arg0: i32, %arg1: memref<16x32xf32, #tpu.memory_space<vmem>>, %arg2: memref<32x256xbf16, #tpu.memory_space<vmem>>, %arg3: memref<1x256xf32, #tpu.memory_space<vmem>>, %arg4: memref<256x128xbf16, #tpu.memory_space<vmem>>, %arg5: memref<1x128xf32, #tpu.memory_space<vmem>>, %arg6: memref<128x64xbf16, #tpu.memory_space<vmem>>, %arg7: memref<1x64xf32, #tpu.memory_space<vmem>>, %arg8: memref<64x16xbf16, #tpu.memory_space<vmem>>, %arg9: memref<1x16xf32, #tpu.memory_space<vmem>>, %arg10: memref<1x16xbf16, #tpu.memory_space<vmem>>, %arg11: memref<1x1xf32, #tpu.memory_space<vmem>>, %arg12: memref<1x16xf32, #tpu.memory_space<vmem>>) attributes {dimension_semantics = [#tpu.dimension_semantics<parallel>], iteration_bounds = array<i64: 1>, scalar_prefetch = 0 : i64, scratch_operands = 0 : i64, tpu.core_type = #tpu.core_type<tc>, window_params = [{transform_indices = @transform_0, window_bounds = array<i64: 16, 32>}, {pipeline_mode = #tpu.pipeline_mode<synchronous>, transform_indices = @transform_1, window_bounds = array<i64: 32, 256>}, {pipeline_mode = #tpu.pipeline_mode<synchronous>, transform_indices = @transform_2, window_bounds = array<i64: 1, 256>}, {pipeline_mode = #tpu.pipeline_mode<synchronous>, transform_indices = @transform_3, window_bounds = array<i64: 256, 128>}, {pipeline_mode = #tpu.pipeline_mode<synchronous>, transform_indices = @transform_4, window_bounds = array<i64: 1, 128>}, {pipeline_mode = #tpu.pipeline_mode<synchronous>, transform_indices = @transform_5, window_bounds = array<i64: 128, 64>}, {pipeline_mode = #tpu.pipeline_mode<synchronous>, transform_indices = @transform_6, window_bounds = array<i64: 1, 64>}, {pipeline_mode = #tpu.pipeline_mode<synchronous>, transform_indices = @transform_7, window_bounds = array<i64: 64, 16>}, {pipeline_mode = #tpu.pipeline_mode<synchronous>, transform_indices = @transform_8, window_bounds = array<i64: 1, 16>}, {pipeline_mode = #tpu.pipeline_mode<synchronous>, transform_indices = @transform_9, window_bounds = array<i64: 1, 16>}, {pipeline_mode = #tpu.pipeline_mode<synchronous>, transform_indices = @transform_10, window_bounds = array<i64: 1, 1>}, {transform_indices = @transform_11, window_bounds = array<i64: 1, 16>}]} {
    %c0 = arith.constant 0 : index
    %c0_0 = arith.constant 0 : index
    %0 = vector.load %arg1[%c0, %c0_0] : memref<16x32xf32, #tpu.memory_space<vmem>>, vector<16x32xf32>
    %1 = arith.truncf %0 : vector<16x32xf32> to vector<16x32xbf16>
    %c0_1 = arith.constant 0 : index
    %c0_2 = arith.constant 0 : index
    %2 = vector.load %arg2[%c0_1, %c0_2] : memref<32x256xbf16, #tpu.memory_space<vmem>>, vector<32x256xbf16>
    %cst = arith.constant dense<0.000000e+00> : vector<16x256xf32>
    %3 = tpu.matmul %1, %2, %cst {dimension_numbers = #tpu.dot_dimension_numbers<[1], [0], [0], [1], [0, 0, 1, 1], [], []>} : vector<16x32xbf16>, vector<32x256xbf16>, vector<16x256xf32> -> vector<16x256xf32>
    %c0_3 = arith.constant 0 : index
    %c0_4 = arith.constant 0 : index
    %4 = vector.load %arg3[%c0_3, %c0_4] : memref<1x256xf32, #tpu.memory_space<vmem>>, vector<1x256xf32>
    %5 = vector.broadcast %4 : vector<1x256xf32> to vector<16x256xf32>
    %6 = arith.addf %3, %5 : vector<16x256xf32>
    %cst_5 = arith.constant 0.000000e+00 : f32
    %7 = vector.broadcast %cst_5 : f32 to vector<16x256xf32>
    %8 = arith.maximumf %6, %7 : vector<16x256xf32>
    %9 = arith.truncf %8 : vector<16x256xf32> to vector<16x256xbf16>
    %c0_6 = arith.constant 0 : index
    %c0_7 = arith.constant 0 : index
    %10 = vector.load %arg4[%c0_6, %c0_7] : memref<256x128xbf16, #tpu.memory_space<vmem>>, vector<256x128xbf16>
    %cst_8 = arith.constant dense<0.000000e+00> : vector<16x128xf32>
    %11 = tpu.matmul %9, %10, %cst_8 {dimension_numbers = #tpu.dot_dimension_numbers<[1], [0], [0], [1], [0, 0, 1, 1], [], []>} : vector<16x256xbf16>, vector<256x128xbf16>, vector<16x128xf32> -> vector<16x128xf32>
    %c0_9 = arith.constant 0 : index
    %c0_10 = arith.constant 0 : index
    %12 = vector.load %arg5[%c0_9, %c0_10] : memref<1x128xf32, #tpu.memory_space<vmem>>, vector<1x128xf32>
    %13 = vector.broadcast %12 : vector<1x128xf32> to vector<16x128xf32>
    %14 = arith.addf %11, %13 : vector<16x128xf32>
    %cst_11 = arith.constant 0.000000e+00 : f32
    %15 = vector.broadcast %cst_11 : f32 to vector<16x128xf32>
    %16 = arith.maximumf %14, %15 : vector<16x128xf32>
    %17 = arith.truncf %16 : vector<16x128xf32> to vector<16x128xbf16>
    %c0_12 = arith.constant 0 : index
    %c0_13 = arith.constant 0 : index
    %18 = vector.load %arg6[%c0_12, %c0_13] : memref<128x64xbf16, #tpu.memory_space<vmem>>, vector<128x64xbf16>
    %cst_14 = arith.constant dense<0.000000e+00> : vector<16x64xf32>
    %19 = tpu.matmul %17, %18, %cst_14 {dimension_numbers = #tpu.dot_dimension_numbers<[1], [0], [0], [1], [0, 0, 1, 1], [], []>} : vector<16x128xbf16>, vector<128x64xbf16>, vector<16x64xf32> -> vector<16x64xf32>
    %c0_15 = arith.constant 0 : index
    %c0_16 = arith.constant 0 : index
    %20 = vector.load %arg7[%c0_15, %c0_16] : memref<1x64xf32, #tpu.memory_space<vmem>>, vector<1x64xf32>
    %21 = vector.broadcast %20 : vector<1x64xf32> to vector<16x64xf32>
    %22 = arith.addf %19, %21 : vector<16x64xf32>
    %cst_17 = arith.constant 0.000000e+00 : f32
    %23 = vector.broadcast %cst_17 : f32 to vector<16x64xf32>
    %24 = arith.maximumf %22, %23 : vector<16x64xf32>
    %25 = arith.truncf %24 : vector<16x64xf32> to vector<16x64xbf16>
    %c0_18 = arith.constant 0 : index
    %c0_19 = arith.constant 0 : index
    %26 = vector.load %arg8[%c0_18, %c0_19] : memref<64x16xbf16, #tpu.memory_space<vmem>>, vector<64x16xbf16>
    %cst_20 = arith.constant dense<0.000000e+00> : vector<16x16xf32>
    %27 = tpu.matmul %25, %26, %cst_20 {dimension_numbers = #tpu.dot_dimension_numbers<[1], [0], [0], [1], [0, 0, 1, 1], [], []>} : vector<16x64xbf16>, vector<64x16xbf16>, vector<16x16xf32> -> vector<16x16xf32>
    %c0_21 = arith.constant 0 : index
    %c0_22 = arith.constant 0 : index
    %28 = vector.load %arg9[%c0_21, %c0_22] : memref<1x16xf32, #tpu.memory_space<vmem>>, vector<1x16xf32>
    %29 = vector.broadcast %28 : vector<1x16xf32> to vector<16x16xf32>
    %30 = arith.addf %27, %29 : vector<16x16xf32>
    %cst_23 = arith.constant 0.000000e+00 : f32
    %31 = vector.broadcast %cst_23 : f32 to vector<16x16xf32>
    %32 = arith.maximumf %30, %31 : vector<16x16xf32>
    %33 = arith.truncf %32 : vector<16x16xf32> to vector<16x16xbf16>
    %c0_24 = arith.constant 0 : index
    %c0_25 = arith.constant 0 : index
    %34 = vector.load %arg10[%c0_24, %c0_25] : memref<1x16xbf16, #tpu.memory_space<vmem>>, vector<1x16xbf16>
    %cst_26 = arith.constant dense<0.000000e+00> : vector<1x16xf32>
    %35 = tpu.matmul %34, %33, %cst_26 {dimension_numbers = #tpu.dot_dimension_numbers<[1], [1], [0], [0], [0, 0, 1, 0], [], []>} : vector<1x16xbf16>, vector<16x16xbf16>, vector<1x16xf32> -> vector<1x16xf32>
    %c0_27 = arith.constant 0 : index
    %c0_28 = arith.constant 0 : index
    %36 = vector.load %arg11[%c0_27, %c0_28] : memref<1x1xf32, #tpu.memory_space<vmem>>, vector<1x1xf32>
    %37 = vector.broadcast %36 : vector<1x1xf32> to vector<1x16xf32>
    %38 = arith.addf %35, %37 : vector<1x16xf32>
    %39 = arith.negf %38 : vector<1x16xf32>
    %40 = math.exp %39 : vector<1x16xf32>
    %cst_29 = arith.constant 1.000000e+00 : f32
    %41 = vector.broadcast %cst_29 : f32 to vector<1x16xf32>
    %42 = arith.addf %41, %40 : vector<1x16xf32>
    %43 = arith.divf %41, %42 : vector<1x16xf32>
    %c0_30 = arith.constant 0 : index
    %c0_31 = arith.constant 0 : index
    %44 = vector.load %arg12[%c0_30, %c0_31] : memref<1x16xf32, #tpu.memory_space<vmem>>, vector<1x16xf32>
    tpu.vector_store %arg12[%c0_30, %c0_31], %43 {strides = array<i32>} : memref<1x16xf32, #tpu.memory_space<vmem>>, vector<1x16xf32>,
    return
  }
  func.func @transform_0(%arg0: i32) -> (i32, i32) {
    %c0_i32 = arith.constant 0 : i32
    %c0_i32_0 = arith.constant 0 : i32
    return %arg0, %c0_i32 : i32, i32
  }
  func.func @transform_1(%arg0: i32) -> (i32, i32) {
    %c0_i32 = arith.constant 0 : i32
    %c0_i32_0 = arith.constant 0 : i32
    %c0_i32_1 = arith.constant 0 : i32
    return %c0_i32, %c0_i32_0 : i32, i32
  }
  func.func @transform_2(%arg0: i32) -> (i32, i32) {
    %c0_i32 = arith.constant 0 : i32
    %c0_i32_0 = arith.constant 0 : i32
    %c0_i32_1 = arith.constant 0 : i32
    return %c0_i32, %c0_i32_0 : i32, i32
  }
  func.func @transform_3(%arg0: i32) -> (i32, i32) {
    %c0_i32 = arith.constant 0 : i32
    %c0_i32_0 = arith.constant 0 : i32
    %c0_i32_1 = arith.constant 0 : i32
    return %c0_i32, %c0_i32_0 : i32, i32
  }
  func.func @transform_4(%arg0: i32) -> (i32, i32) {
    %c0_i32 = arith.constant 0 : i32
    %c0_i32_0 = arith.constant 0 : i32
    %c0_i32_1 = arith.constant 0 : i32
    return %c0_i32, %c0_i32_0 : i32, i32
  }
  func.func @transform_5(%arg0: i32) -> (i32, i32) {
    %c0_i32 = arith.constant 0 : i32
    %c0_i32_0 = arith.constant 0 : i32
    %c0_i32_1 = arith.constant 0 : i32
    return %c0_i32, %c0_i32_0 : i32, i32
  }
  func.func @transform_6(%arg0: i32) -> (i32, i32) {
    %c0_i32 = arith.constant 0 : i32
    %c0_i32_0 = arith.constant 0 : i32
    %c0_i32_1 = arith.constant 0 : i32
    return %c0_i32, %c0_i32_0 : i32, i32
  }
  func.func @transform_7(%arg0: i32) -> (i32, i32) {
    %c0_i32 = arith.constant 0 : i32
    %c0_i32_0 = arith.constant 0 : i32
    %c0_i32_1 = arith.constant 0 : i32
    return %c0_i32, %c0_i32_0 : i32, i32
  }
  func.func @transform_8(%arg0: i32) -> (i32, i32) {
    %c0_i32 = arith.constant 0 : i32
    %c0_i32_0 = arith.constant 0 : i32
    %c0_i32_1 = arith.constant 0 : i32
    return %c0_i32, %c0_i32_0 : i32, i32
  }
  func.func @transform_9(%arg0: i32) -> (i32, i32) {
    %c0_i32 = arith.constant 0 : i32
    %c0_i32_0 = arith.constant 0 : i32
    %c0_i32_1 = arith.constant 0 : i32
    return %c0_i32, %c0_i32_0 : i32, i32
  }
  func.func @transform_10(%arg0: i32) -> (i32, i32) {
    %c0_i32 = arith.constant 0 : i32
    %c0_i32_0 = arith.constant 0 : i32
    %c0_i32_1 = arith.constant 0 : i32
    return %c0_i32, %c0_i32_0 : i32, i32
  }
  func.func @transform_11(%arg0: i32) -> (i32, i32) {
    %c0_i32 = arith.constant 0 : i32
    %c0_i32_0 = arith.constant 0 : i32
    return %c0_i32, %arg0 : i32, i32
  }
}

</mosaic_0001>

<bundles_post_ra>
// kernel: mlp_forward.1
= control target key start
LH: loop header
LB: loop body
LE: loop exit
PB: predicated region body
PF: predicated region fallthrough
CT: control target
= control target key end

     0   :  { %s885_s0 = inlined_call_operand.vmem [shape: f32[16,32], index: 0, kind: input, shape index: {}]   ;;  %s886_s1 = inlined_call_operand.vmem [shape: bf16[32,256], index: 1, kind: input, shape index: {}]   ;;  %s887_s2 = inlined_call_operand.vmem [shape: f32[1,256], index: 2, kind: input, shape index: {}]   ;;  %s888_s3 = inlined_call_operand.hbm [shape: bf16[256,128], index: 3, kind: input, shape index: {}]   ;;  %s889_s4 = inlined_call_operand.vmem [shape: f32[1,128], index: 4, kind: input, shape index: {}]   ;;  %s890_s5 = inlined_call_operand.vmem [shape: bf16[128,64], index: 5, kind: input, shape index: {}]   ;;  %s891_s6 = inlined_call_operand.vmem [shape: f32[1,64], index: 6, kind: input, shape index: {}]   ;;  %s892_s7 = inlined_call_operand.vmem [shape: bf16[64,16], index: 7, kind: input, shape index: {}]   ;;  %s893_s8 = inlined_call_operand.vmem [shape: f32[1,16], index: 8, kind: input, shape index: {}]   ;;  %s894_s9 = inlined_call_operand.vmem [shape: bf16[1,16], index: 9, kind: input, shape index: {}]   ;;  %s895_s10 = inlined_call_operand.<no memory space> [shape: f32[1,1], index: 10, kind: input, shape index: {}]   ;;  %s896_s11 = inlined_call_operand.hbm [shape: f32[1,16], index: 11, kind: output, shape index: {}]  }
   0x1   :  { %v16_v0 = vstv %s895_s10 }
   0x2   :  { %17 = vst [vmem:[#allocation2] sm:$0x1] %v16_v0 }
   0x3   :  { %18 = vsyncpa [#allocation4], 0 }
   0x4   :  { %19 = vsyncpa [#allocation5], 0  ;;  %s30_s21 = sshll.u32 %s888_s3, 4  ;;  %s730_s22 = smov [#allocation3]   ;;  %s31_s21 = int_to_ptr.hbm [resolvable:$true] %s30_s21 }
   0x5   :  { %s32_s23 = sshll.u32 %s730_s22, 4  ;;  %s731_s24 = smov 64   ;;  %s33_s23 = int_to_ptr.vmem [resolvable:$true] %s32_s23 }
   0x6   :  { %s732_s25 = smov 4  }
   0x7   :  { %38 = dma.hbm_to_vmem [thread:$0]  %s31_s21, 2048, %s33_s23, [#allocation4], %s731_s24, %s731_s24, %s732_s25  }
   0x8   :  { %726 = dma.done.wait [#allocation4], 2048  }
   0x9   :  { %727 = vsyncadd [#allocation4], 4294965248  ;;  %v510_v1 = vld [vmem:[%s886_s1 + $0x10] sm:$0xf]  ;;  %v636_v2 = vld [vmem:[%s886_s1 + $0x14] sm:$0xf0] }
   0xa   :  { %v635_v3 = vld [vmem:[%s886_s1 + $0x14] sm:$0xf]  ;;  %v511_v4 = vor.u32 %v636_v2, %v510_v1  ;;  %v512_v5 = vld [vmem:[%s886_s1 + $0x18] sm:$0xf0]  ;;  %v502_v6 = vld [vmem:[%s886_s1] sm:$0xf] }
   0xb   :  { %v634_v7 = vld [vmem:[%s886_s1 + $0x4] sm:$0xf0]  ;;  %v515_v8 = vor.u32 %v635_v3, %v512_v5  ;;  %v633_v9 = vld [vmem:[%s886_s1 + $0x4] sm:$0xf]  ;;  %v504_v10 = vld [vmem:[%s886_s1 + $0x8] sm:$0xf0] }
   0xc   :  { %v58_v11 = vld [vmem:[%s885_s0] sm:$0xff]  ;;  %101 = vmatpush.bf16.msra.mxu0 %v511_v4  ;;  %v503_v12 = vor.u32 %v634_v7, %v502_v6  ;;  %v59_v13 = vld [vmem:[%s885_s0 + $0x8] sm:$0xff]  ;;  %v507_v16 = vor.u32 %v633_v9, %v504_v10  ;;  %v643_v17 = vld [vmem:[#allocation3 + $0x30] sm:$0xff]  ;;  %vm91_vm0 = vcmask 261120   ;;  %vm413_vm1 = vcmask 523264   ;;  %s490_s30 = sshll.u32 %s896_s11, 4  ;;  %s491_s30 = int_to_ptr.hbm [resolvable:$true] %s490_s30 }
   0xd   :  { %v644_v14 = vld [vmem:[#allocation3 + $0x38] sm:$0xff]  ;;  %115 = vmatpush.bf16.msra.mxu1 %v515_v8  ;;  %v651_v18 = vld [vmem:[#allocation3 + $0x70] sm:$0xff]  ;;  %v60_v19 = vpack.c.bf16 %v59_v13, %v58_v11  ;;  %v642_v20 = vld [vmem:[#allocation3 + $0x28] sm:$0xff]  ;;  %vm442_vm2 = vcmask 130048   ;;  %vm481_vm6 = vcmask 122880  }
   0xe   :  { %v652_v15 = vld [vmem:[#allocation3 + $0x78] sm:$0xff]  ;;  %261 = vmatpush.bf16.msra.mxu2 %v644_v14  ;;  %v650_v21 = vld [vmem:[#allocation3 + $0x68] sm:$0xff]  ;;  %v641_v22 = vld [vmem:[#allocation3 + $0x20] sm:$0xff] }
   0xf   :  { %275 = vmatpush.bf16.msra.mxu3 %v652_v15  ;;  %v649_v23 = vld [vmem:[#allocation3 + $0x60] sm:$0xff]  ;;  %v640_v24 = vld [vmem:[#allocation3 + $0x18] sm:$0xff]  ;;  %v639_v26 = vld [vmem:[#allocation3 + $0x10] sm:$0xff] }
  0x10   :  { %102 = vmatpush.bf16.msra.mxu0 %v503_v12  ;;  %v648_v25 = vld [vmem:[#allocation3 + $0x58] sm:$0xff]  ;;  %v647_v27 = vld [vmem:[#allocation3 + $0x50] sm:$0xff]  ;;  %v638_v28 = vld [vmem:[#allocation3 + $0x8] sm:$0xff] }
  0x11   :  { %116 = vmatpush.bf16.msra.mxu1 %v507_v16  ;;  %v646_v29 = vld [vmem:[#allocation3 + $0x48] sm:$0xff]  ;;  %v637_v30 = vld [vmem:[#allocation3] sm:$0xff]  ;;  %v660_v32 = vld [vmem:[%s890_s5 + $0x38] sm:$0xff] }
  0x12   :  { %262 = vmatpush.bf16.msra.mxu2 %v643_v17  ;;  %v645_v31 = vld [vmem:[#allocation3 + $0x40] sm:$0xff]  ;;  %v659_v33 = vld [vmem:[%s890_s5 + $0x30] sm:$0xff]  ;;  %v656_v53 = vld [vmem:[%s890_s5 + $0x18] sm:$0xff] }
  0x13   :  { %276 = vmatpush.bf16.msra.mxu3 %v651_v18  ;;  %516 = vmatmul.msk.bf16.vlgmr.msra.gmra.mxu0 %vm91_vm0, %v60_v19  ;;  %v658_v34 = vld [vmem:[%s890_s5 + $0x28] sm:$0xff]  ;;  %v657_v35 = vld [vmem:[%s890_s5 + $0x20] sm:$0xff]  ;;  %v655_v54 = vld [vmem:[%s890_s5 + $0x10] sm:$0xff]  ;;  %v733_v18 = vmov 0  }
  0x14   :  { %517 = vmatmul.msk.bf16.vlgmr.msra.gmra.mxu1 %vm91_vm0, %v60_v19  ;;  %360 = vmatpush.bf16.msrb.mxu0 %v660_v32  ;;  %v65_v36 = vld [vmem:[%s887_s2] sm:$0x3]  ;;  %v654_v55 = vld [vmem:[%s890_s5 + $0x8] sm:$0xff]  ;;  %v664_v5 = vld [vmem:[%s892_s7 + $0x18] sm:$0xff] }
  0x15   :  { %v67_v39 = vperm.slane %v65_v36, 0  ;;  %v68_v40 = vperm.slane %v65_v36, 1  ;;  %v653_v56 = vld [vmem:[%s890_s5] sm:$0xff]  ;;  %421 = vmatpush.bf16.msrb.mxu1 %v664_v5  ;;  %v663_v6 = vld [vmem:[%s892_s7 + $0x10] sm:$0xff]  ;;  %v662_v7 = vld [vmem:[%s892_s7 + $0x8] sm:$0xff]  ;;  %670 = vset.pattern.permute.xlu0 %v733_v18 }
  0x16   :  { %263 = vmatpush.bf16.msra.mxu2 %v642_v20  ;;  %v671_v58 = vld [vmem:[%s889_s4] ss:$0 sm:$0xff] }
  0x17   :  { %277 = vmatpush.bf16.msra.mxu3 %v650_v21  ;;  %v661_v8 = vld [vmem:[%s892_s7] sm:$0xff] }
  0x18   :  { %361 = vmatpush.bf16.msrb.mxu0 %v659_v33  ;;  %v672_v10 = vld [vmem:[%s891_s6] ss:$0 sm:$0xff] }
  0x19   :  { %422 = vmatpush.bf16.msrb.mxu1 %v663_v6  ;;  %v435_v17 = vld [vmem:[#allocation2] sm:$0x1] }
  0x1a   :  { %264 = vmatpush.bf16.msra.mxu2 %v641_v22  ;;  %438 = vperm.xlu0 %670, %v435_v17   ;;  %v673_v20 = vld [vmem:[%s893_s8] ss:$0 sm:$0xff]  ;;  %s734_s8 = smov [#allocation6]  }
  0x1b   :  { %278 = vmatpush.bf16.msra.mxu3 %v649_v23 }
  0x1c   :  { %362 = vmatpush.bf16.msrb.mxu0 %v658_v34 }
  0x1d   :  { %423 = vmatpush.bf16.msrb.mxu1 %v662_v7 }
  0x1e   :  { %265 = vmatpush.bf16.msra.mxu2 %v640_v24 }
  0x1f   :  { %279 = vmatpush.bf16.msra.mxu3 %v648_v25 }
  0x20   :  { %363 = vmatpush.bf16.msrb.mxu0 %v657_v35 }
  0x21   :  { %424 = vmatpush.bf16.msrb.mxu1 %v661_v8 }
  0x22   :  { %266 = vmatpush.bf16.msra.mxu2 %v639_v26 }
  0x23   :  { %280 = vmatpush.bf16.msra.mxu3 %v647_v27 }
  0x24   :  { %364 = vmatpush.bf16.msrb.mxu0 %v656_v53 }
  0x26   :  { %267 = vmatpush.bf16.msra.mxu2 %v638_v28  ;;  %v434_v28 = vld [vmem:[%s894_s9] sm:$0x1]  ;;  %s488_s9 = sshll.u32 %s734_s8, 4  ;;  %s489_s9 = int_to_ptr.vmem [resolvable:$true] %s488_s9 }
  0x27   :  { %281 = vmatpush.bf16.msra.mxu3 %v646_v29 }
  0x28   :  { %365 = vmatpush.bf16.msrb.mxu0 %v655_v54 }
  0x2a   :  { %268 = vmatpush.bf16.msra.mxu2 %v637_v30 }
  0x2b   :  { %282 = vmatpush.bf16.msra.mxu3 %v645_v31 }
  0x2c   :  { %366 = vmatpush.bf16.msrb.mxu0 %v654_v55 }
  0x30   :  { %367 = vmatpush.bf16.msrb.mxu0 %v653_v56 }
  0x8c   :  { %v439_v29 = vpop.permute.xlu0 %438 }
  0x8d   :  { %v441_v30 = vperm.slane %v439_v29, 0 }
  0x90   :  { %v104_v37 = vpop.f32.mrf.mxu0 }
  0x91   :  { %v118_v38 = vpop.f32.mrf.mxu1  ;;  %v105_v41 = vadd.f32 %v104_v37, %v67_v39 }
  0x92   :  { %v119_v42 = vadd.f32 %v118_v38, %v68_v40 }
  0x93   :  { %v123_v47 = vmax.f32 %v105_v41, 0.0 }
  0x94   :  { %v124_v49 = vmax.f32 %v119_v42, 0.0 }
  0x98   :  { %v106_v43 = vpop.f32.mrf.mxu0 }
  0x99   :  { %v107_v44 = vadd.f32 %v106_v43, %v67_v39  ;;  %v120_v45 = vpop.f32.mrf.mxu1 }
  0x9a   :  { %v121_v46 = vadd.f32 %v120_v45, %v68_v40 }
  0x9b   :  { %v125_v48 = vmax.f32 %v107_v44, 0.0 }
  0x9c   :  { %v126_v50 = vmax.f32 %v121_v46, 0.0 }
  0x9d   :  { %v127_v51 = vpack.c.bf16 %v125_v48, %v123_v47 }
  0x9e   :  { %v128_v52 = vpack.c.bf16 %v126_v50, %v124_v49 }
  0x9f   :  { %269 = vmatmul.bf16.vlgmr.msra.gmra.mxu2 %v127_v51 }
  0xa0   :  { %283 = vmatmul.bf16.vlgmr.msra.gmra.mxu3 %v128_v52 }
 0x122   :  { %v270_v57 = vpop.f32.mrf.mxu2 }
 0x123   :  { %v284_v59 = vpop.f32.mrf.mxu3  ;;  %v271_v60 = vadd.f32 %v671_v58, %v270_v57 }
 0x125   :  { %v285_v62 = vadd.f32 %v284_v59, %v271_v60 }
 0x127   :  { %v289_v2 = vmax.f32 %v285_v62, 0.0 }
 0x12a   :  { %v272_v61 = vpop.f32.mrf.mxu2 }
 0x12b   :  { %v273_v63 = vadd.f32 %v671_v58, %v272_v61  ;;  %v286_v0 = vpop.f32.mrf.mxu3 }
 0x12d   :  { %v287_v1 = vadd.f32 %v286_v0, %v273_v63 }
 0x12f   :  { %v290_v3 = vmax.f32 %v287_v1, 0.0 }
 0x131   :  { %v291_v4 = vpack.c.bf16 %v290_v3, %v289_v2 }
 0x133   :  { %368 = vmatmul.bf16.vlgmr.msrb.gmra.mxu0 %v291_v4 }
 0x1b0   :  { %v369_v9 = vpop.f32.mrf.mxu0 }
 0x1b1   :  { %v370_v11 = vadd.f32 %v672_v10, %v369_v9 }
 0x1b3   :  { %v374_v14 = vmax.f32 %v370_v11, 0.0 }
 0x1b8   :  { %v371_v12 = vpop.f32.mrf.mxu0 }
 0x1b9   :  { %v372_v13 = vadd.f32 %v672_v10, %v371_v12 }
 0x1bb   :  { %v375_v15 = vmax.f32 %v372_v13, 0.0 }
 0x1bd   :  { %v376_v16 = vpack.c.bf16 %v375_v15, %v374_v14 }
 0x1bf   :  { %630 = vmatmul.msk.bf16.vlgmr.msrb.gmra.mxu1 %vm413_vm1, %v376_v16 }
 0x23c   :  { %v426_v19 = vpop.f32.mrf.mxu1 }
 0x23d   :  { %v427_v21 = vadd.f32 %v673_v20, %v426_v19 }
 0x23f   :  { %v431_v24 = vmax.f32 %v427_v21, 0.0 }
 0x244   :  { %v428_v22 = vpop.f32.mrf.mxu1 }
 0x245   :  { %v429_v23 = vadd.f32 %v673_v20, %v428_v22 }
 0x247   :  { %v432_v25 = vmax.f32 %v429_v23, 0.0 }
 0x249   :  { %v433_v26 = vpack.c.bf16 %v432_v25, %v431_v24 }
 0x24b   :  { %v447_v27 = vsel %vm442_vm2, %v433_v26, 0 }
 0x24c   :  { %456 = vmatpush.bf16.xpose.msra.mxu1 %v447_v27 }
 0x253   :  { %631 = vmatmul.msk.bf16.vlgmr.msra.gmra.mxu1 %vm442_vm2, %v434_v28 }
 0x2d0   :  { %v458_v31 = vpop.f32.mrf.mxu1 }
 0x2d1   :  { %v459_v32 = vadd.f32 %v458_v31, %v441_v30 }
 0x2d3   :  { %v632_v33 = vmul.f32 -1.442695, %v459_v32 }
 0x2d5   :  { %674 = vpow2.f32 %v632_v33 }
 0x2d8   :  { %v460_v34 = vpop.f32.mrf.mxu1 }
 0x2db   :  { %v675_v35 = vpop.eup %674 }
 0x2dc   :  { %v465_v36 = vadd.f32 1.0, %v675_v35 }
 0x2de   :  { %676 = vrcp.f32 %v465_v36  ;;  %v477_v40 = vand.u32 2147483648, %v465_v36  ;;  %v475_v42 = vand.u32 2147483647, %v465_v36  ;;  %vm471_vm4 = vweird.f32 %v465_v36 }
 0x2e0   :  { %v478_v44 = vor.u32 1.1754944e-38, %v477_v40  ;;  %vm476_vm7 = vcmp.eq.f32.partialorder %v475_v42, 8.507059e+37 }
 0x2e4   :  { %v677_v37 = vpop.eup %676 }
 0x2e5   :  { %v467_v38 = vmul.f32 %v677_v37, %v465_v36  ;;  %vm472_vm3 = vweird.f32 %v677_v37 }
 0x2e6   :  { %vm473_vm5 = vmor %vm471_vm4, %vm472_vm3 }
 0x2e7   :  { %v468_v39 = vsub.f32 1.0, %v467_v38 }
 0x2e9   :  { %v469_v41 = vmul.f32 %v677_v37, %v468_v39 }
 0x2eb   :  { %v470_v43 = vadd.f32 %v677_v37, %v469_v41 }
 0x2ed   :  { %v474_v45 = vsel %vm473_vm5, %v677_v37, %v470_v43 }
 0x2ee   :  { %v479_v46 = vsel %vm476_vm7, %v478_v44, %v474_v45 }
 0x2ef   :  { %482 = vst.msk [vmem:[#allocation6] sm:$0x1] %vm481_vm6, %v479_v46 }
 0x2f0   :  { %493 = dma.vmem_to_hbm [thread:$0]  %s489_s9, 16, %s491_s30, [#allocation5]  }
 0x2f1   :  { %728 = dma.done.wait [#allocation5], 16  }
 0x2f2   :  { %729 = vsyncadd [#allocation5], 4294967280 }
 0x2f3   :  { %498 = vsyncpa [#allocation4], 1 }
 0x2f4   :  { %499 = vsyncpa [#allocation5], 1 }

</bundles_post_ra>
